<compile_context>
chip_gen: v7x
topology: tpu7x:2x2x1
jax: 0.10.0
libtpu: 0.0.40
codegen_flags: <defaults>
</compile_context>

<pallas_src>
import functools

import jax
import jax.numpy as jnp
from jax.experimental import pallas as pl
from jax.experimental.pallas import tpu as pltpu


def _mx_snn_kernel(x_ref, w_ref, g_ref, be_ref, mem_ref,
                   spk_out_ref, mem_out_ref,
                   *, N, Cout, K, pad, Lout, Lp,
                   lif_beta, threshold, eps):
    """Whole-block kernel; everything lives in VMEM (toy shapes).

    Layout: channel-major, lane-padded.  Each batch element owns a 128-aligned segment
    of length Lp (a multiple of 128) on the lane axis; columns beyond the valid data
    are zero and double as the conv zero-padding.

    x_ref       : (Cin,  N*Lp)  f32   zero-padded input
    w_ref       : (K, Cout, Cin) bf16 conv taps
    g_ref       : (Cout, 1)     f32   BN gamma
    be_ref      : (Cout, 1)     f32   BN beta
    mem_ref     : (Cout, N*Lp)  f32   LIF membrane (aliased with mem_out_ref)
    spk_out_ref : (Cout, N*Lp)  f32   sliding-window spike map (wrapper subsamples /4)
    mem_out_ref : (Cout, N*Lp)  f32
    """
    NW = N * Lp

    # ---------------- Conv1d: K accumulated MXU matmuls over lane-rolled x -------------
    xv = x_ref[...]                                        # (Cin, NW) f32, loaded once
    y = None
    for k in range(K):                                     # tiny static loop (unrolled)
        off = k - pad                                      # tap offset into x
        # xs[:, j] = xv[:, j + off] (circular); zero-padded tails make edges correct,
        # wrapped columns only land in the invalid tail and are masked below.
        xs = xv if off == 0 else pltpu.roll(xv, shift=(-off) % NW, axis=1)
        part = jnp.dot(w_ref[k], xs.astype(jnp.bfloat16),   # bf16 MXU feed, f32 acc
                       preferred_element_type=jnp.float32)  # (Cout, NW)
        y = part if y is None else y + part

    # Validity mask: within each Lp segment only the first Lout columns are real.
    lane = jax.lax.broadcasted_iota(jnp.int32, (1, Lp), 1)
    valid = jnp.tile(lane, (1, N)) < Lout                  # (1, NW)
    y = jnp.where(valid, y, 0.0)                           # keep BN stats exact

    # -------- BatchNorm1d (training-mode batch stats), single pass, fused affine -------
    inv_cnt = 1.0 / float(N * Lout)
    s = jnp.sum(y, axis=1, keepdims=True)                  # (Cout, 1)
    sq = jnp.sum(y * y, axis=1, keepdims=True)             # (Cout, 1)
    mean = s * inv_cnt
    var = sq * inv_cnt - mean * mean                       # biased variance (PyTorch)
    scale = jax.lax.rsqrt(var + eps) * g_ref[...]          # EUP rsqrt
    shift = be_ref[...] - mean * scale
    yn = y * scale + shift                                 # one bcast mul + bcast add

    # ---------------- snnTorch Leaky (subtract reset) ----------------
    mem = mem_ref[...]
    mem_new = lif_beta * mem + yn - jnp.where(mem > threshold, threshold, 0.0)
    mem_new = jnp.where(valid, mem_new, 0.0)               # keep carried state clean
    mem_out_ref[...] = mem_new                             # single lane-dense store

    # ---------------- MaxPool1d(4): window max via rolls, threshold once ----------------
    # win[:, j] = max(mem_new[:, j .. j+3]); the wrapper keeps columns j = 4*t per
    # segment (t < Lpool), which never touch wrapped / invalid columns.
    w1 = pltpu.roll(mem_new, shift=NW - 1, axis=1)
    w2 = pltpu.roll(mem_new, shift=NW - 2, axis=1)
    w3 = pltpu.roll(mem_new, shift=NW - 3, axis=1)
    win = jnp.maximum(jnp.maximum(mem_new, w1), jnp.maximum(w2, w3))
    spk_out_ref[...] = jnp.where(win > threshold, 1.0, 0.0)  # ONE lane-dense store


def _round_up(v, m):
    return ((v + m - 1) // m) * m


@functools.partial(jax.jit,
                   static_argnames=("ksize", "step", "lif_beta", "threshold", "eps"))
def mx_snn_block(x, w, b, gamma, beta_bn, mem, *, ksize, step=1,
                 lif_beta=0.9, threshold=1.0, eps=1e-5):
    """Wrapper: layout plumbing only; all compute is in the Pallas kernel.

    NOTE: the conv bias is dropped because training-mode BatchNorm (batch statistics,
    as in the PyTorch module's default train() path) cancels it exactly.  If this block
    is ever run with eval-mode BN (running stats) the bias must be re-added.
    """
    del b
    assert step == 1, "TODO(synk): Conv1d stride > 1 not implemented"
    assert ksize >= 2, "pad = ksize//2 - 1 would be negative for ksize < 2"
    N, Cin, L = x.shape
    Cout = w.shape[0]
    K = ksize
    pad = K // 2 - 1
    Lout = (L + 2 * pad - K) // step + 1
    Lpool = Lout // 4                  # MaxPool1d floor behaviour
    Lp = _round_up(L + pad, 128)       # lane-padded per-batch segment (also >= Lout)
    NW = N * Lp

    # Parameter prep (folded / CSE'd by XLA under jit).
    w_k = jnp.transpose(w, (2, 0, 1)).astype(jnp.bfloat16)          # (K, Cout, Cin)
    g2 = gamma.reshape(Cout, 1).astype(jnp.float32)
    be2 = beta_bn.reshape(Cout, 1).astype(jnp.float32)

    # Channel-major, lane-padded flat layouts (zero tails = conv padding).
    # TODO(synk): when driven by a per-timestep loop, keep mem in this flat layout
    #             across steps and move these transposes to the loop boundaries.
    x_cm = jnp.transpose(x.astype(jnp.float32), (1, 0, 2))          # (Cin, N, L)
    x_flat = jnp.zeros((Cin, N, Lp), jnp.float32).at[:, :, :L].set(x_cm).reshape(Cin, NW)
    mem_cm = jnp.transpose(mem.astype(jnp.float32), (1, 0, 2))      # (Cout, N, Lout)
    mem_flat = (jnp.zeros((Cout, N, Lp), jnp.float32)
                .at[:, :, :Lout].set(mem_cm).reshape(Cout, NW))

    kernel = functools.partial(
        _mx_snn_kernel, N=N, Cout=Cout, K=K, pad=pad, Lout=Lout, Lp=Lp,
        lif_beta=float(lif_beta), threshold=float(threshold), eps=float(eps))

    vmem = pl.BlockSpec(memory_space=pltpu.MemorySpace.VMEM)
    spk_win_flat, mem_out_flat = pl.pallas_call(
        kernel,
        out_shape=(jax.ShapeDtypeStruct((Cout, NW), jnp.float32),
                   jax.ShapeDtypeStruct((Cout, NW), jnp.float32)),
        in_specs=[vmem] * 5,
        out_specs=(vmem, vmem),
        input_output_aliases={4: 1},   # membrane state updated in place
    )(x_flat, w_k, g2, be2, mem_flat)

    # Layout plumbing back to the module's (N, C, L) convention.
    spk = jnp.transpose(
        spk_win_flat.reshape(Cout, N, Lp)[:, :, 0:4 * Lpool:4], (1, 0, 2))
    mem_out = jnp.transpose(
        mem_out_flat.reshape(Cout, N, Lp)[:, :, :Lout], (1, 0, 2))
    return spk, mem_out


def reference_forward(x, w, b, gamma, beta_bn, mem, *, lif_beta, threshold=1.0, eps=1e-5):
    """Pure-JAX reference mirroring the PyTorch module (training-mode BN, bias kept).

    Conv operands are rounded to bf16 (same quantisation as the kernel's MXU feed),
    accumulation in f32, so the comparison isolates implementation error."""
    K = w.shape[2]
    pad = K // 2 - 1
    y = jax.lax.conv_general_dilated(
        x.astype(jnp.bfloat16), w.astype(jnp.bfloat16), window_strides=(1,),
        padding=[(pad, pad)], dimension_numbers=("NCH", "OIH", "NCH"),
        preferred_element_type=jnp.float32)
    y = y + b[None, :, None]
    mean = y.mean(axis=(0, 2), keepdims=True)
    var = ((y - mean) ** 2).mean(axis=(0, 2), keepdims=True)
    yn = (y - mean) / jnp.sqrt(var + eps) * gamma[None, :, None] + beta_bn[None, :, None]
    reset = (mem > threshold).astype(jnp.float32)
    mem_new = lif_beta * mem + yn - reset * threshold
    spk = (mem_new > threshold).astype(jnp.float32)
    N, Cout, Lout = spk.shape
    Lpool = Lout // 4
    pooled_spk = spk[:, :, :Lpool * 4].reshape(N, Cout, Lpool, 4).max(axis=-1)
    pooled_mem = mem_new[:, :, :Lpool * 4].reshape(N, Cout, Lpool, 4).max(axis=-1)
    return pooled_spk, mem_new, pooled_mem


if __name__ == "__main__":
    key = jax.random.PRNGKey(0)
    k1, k2, k3, k4, k5, k6 = jax.random.split(key, 6)

    # Module hyperparams: in_chn=4, out_chn=8, ksize=4, lif_beta=0.9, step=1
    N, Cin, Cout, L, K = 2, 4, 8, 16, 4
    lif_beta = 0.9
    pad = K // 2 - 1
    Lout = L + 2 * pad - K + 1        # = 15
    Lpool = Lout // 4                 # = 3

    # Deterministic synthetic parameters / inputs.
    x = jax.random.normal(k1, (N, Cin, L), jnp.float32)
    w = 0.3 * jax.random.normal(k2, (Cout, Cin, K), jnp.float32)      # Conv1d weight
    b = 0.1 * jax.random.normal(k3, (Cout,), jnp.float32)             # Conv1d bias
    gamma = 1.0 + 0.1 * jax.random.normal(k4, (Cout,), jnp.float32)   # BN weight
    beta_bn = 0.1 * jax.random.normal(k5, (Cout,), jnp.float32)       # BN bias
    mem = jax.random.normal(k6, (N, Cout, Lout), jnp.float32)         # LIF membrane

    spk, mem_out = mx_snn_block(x, w, b, gamma, beta_bn, mem,
                                ksize=K, step=1, lif_beta=lif_beta)
    jax.block_until_ready((spk, mem_out))

    spk_ref, mem_ref_arr, pooled_mem_ref = reference_forward(
        x, w, b, gamma, beta_bn, mem, lif_beta=lif_beta)

    assert spk.shape == (N, Cout, Lpool) and mem_out.shape == (N, Cout, Lout)
    assert jnp.allclose(mem_out, mem_ref_arr, atol=1e-3, rtol=1e-3), "membrane mismatch"
    # Spikes are a hard threshold; compare only where the reference pooled membrane is
    # not within accumulation-order distance of the threshold.
    safe = jnp.abs(pooled_mem_ref - 1.0) > 1e-3
    assert bool(jnp.all(jnp.where(safe, spk == spk_ref, True))), "spike mismatch"
    print("KERNEL_OK")
</pallas_src>

<mosaic_0001>
module attributes {stable_mosaic.version = 11 : i64} {
  func.func @_mx_snn_kernel(%arg0: memref<4x256xf32, #tpu.memory_space<vmem>>, %arg1: memref<4x8x4xbf16, #tpu.memory_space<vmem>>, %arg2: memref<8x1xf32, #tpu.memory_space<vmem>>, %arg3: memref<8x1xf32, #tpu.memory_space<vmem>>, %arg4: memref<8x256xf32, #tpu.memory_space<vmem>>, %arg5: memref<8x256xf32, #tpu.memory_space<vmem>>, %arg6: memref<8x256xf32, #tpu.memory_space<vmem>>) attributes {dimension_semantics = [], scalar_prefetch = 0 : i64, scratch_operands = 0 : i64, tpu.core_type = #tpu.core_type<tc>} {
    %c0 = arith.constant 0 : index
    %c0_0 = arith.constant 0 : index
    %0 = vector.load %arg0[%c0, %c0_0] : memref<4x256xf32, #tpu.memory_space<vmem>>, vector<4x256xf32>
    %c1_i32 = arith.constant 1 : i32
    %1 = tpu.dynamic_rotate %0 by %c1_i32 dim 1 : vector<4x256xf32>, i32 -> vector<4x256xf32>
    %c0_1 = arith.constant 0 : index
    %c0_2 = arith.constant 0 : index
    %c0_3 = arith.constant 0 : index
    %2 = vector.load %arg1[%c0_1, %c0_2, %c0_3] : memref<4x8x4xbf16, #tpu.memory_space<vmem>>, vector<1x8x4xbf16>
    %3 = vector.shape_cast %2 : vector<1x8x4xbf16> to vector<8x4xbf16>
    %4 = arith.truncf %1 : vector<4x256xf32> to vector<4x256xbf16>
    %cst = arith.constant dense<0.000000e+00> : vector<8x256xf32>
    %5 = tpu.matmul %3, %4, %cst {dimension_numbers = #tpu.dot_dimension_numbers<[1], [0], [0], [1], [0, 0, 1, 1], [], []>} : vector<8x4xbf16>, vector<4x256xbf16>, vector<8x256xf32> -> vector<8x256xf32>
    %c1 = arith.constant 1 : index
    %c0_4 = arith.constant 0 : index
    %c0_5 = arith.constant 0 : index
    %6 = vector.load %arg1[%c1, %c0_4, %c0_5] : memref<4x8x4xbf16, #tpu.memory_space<vmem>>, vector<1x8x4xbf16>
    %7 = vector.shape_cast %6 : vector<1x8x4xbf16> to vector<8x4xbf16>
    %8 = arith.truncf %0 : vector<4x256xf32> to vector<4x256xbf16>
    %cst_6 = arith.constant dense<0.000000e+00> : vector<8x256xf32>
    %9 = tpu.matmul %7, %8, %cst_6 {dimension_numbers = #tpu.dot_dimension_numbers<[1], [0], [0], [1], [0, 0, 1, 1], [], []>} : vector<8x4xbf16>, vector<4x256xbf16>, vector<8x256xf32> -> vector<8x256xf32>
    %10 = arith.addf %5, %9 : vector<8x256xf32>
    %c255_i32 = arith.constant 255 : i32
    %11 = tpu.dynamic_rotate %0 by %c255_i32 dim 1 : vector<4x256xf32>, i32 -> vector<4x256xf32>
    %c2 = arith.constant 2 : index
    %c0_7 = arith.constant 0 : index
    %c0_8 = arith.constant 0 : index
    %12 = vector.load %arg1[%c2, %c0_7, %c0_8] : memref<4x8x4xbf16, #tpu.memory_space<vmem>>, vector<1x8x4xbf16>
    %13 = vector.shape_cast %12 : vector<1x8x4xbf16> to vector<8x4xbf16>
    %14 = arith.truncf %11 : vector<4x256xf32> to vector<4x256xbf16>
    %cst_9 = arith.constant dense<0.000000e+00> : vector<8x256xf32>
    %15 = tpu.matmul %13, %14, %cst_9 {dimension_numbers = #tpu.dot_dimension_numbers<[1], [0], [0], [1], [0, 0, 1, 1], [], []>} : vector<8x4xbf16>, vector<4x256xbf16>, vector<8x256xf32> -> vector<8x256xf32>
    %16 = arith.addf %10, %15 : vector<8x256xf32>
    %c254_i32 = arith.constant 254 : i32
    %17 = tpu.dynamic_rotate %0 by %c254_i32 dim 1 : vector<4x256xf32>, i32 -> vector<4x256xf32>
    %c3 = arith.constant 3 : index
    %c0_10 = arith.constant 0 : index
    %c0_11 = arith.constant 0 : index
    %18 = vector.load %arg1[%c3, %c0_10, %c0_11] : memref<4x8x4xbf16, #tpu.memory_space<vmem>>, vector<1x8x4xbf16>
    %19 = vector.shape_cast %18 : vector<1x8x4xbf16> to vector<8x4xbf16>
    %20 = arith.truncf %17 : vector<4x256xf32> to vector<4x256xbf16>
    %cst_12 = arith.constant dense<0.000000e+00> : vector<8x256xf32>
    %21 = tpu.matmul %19, %20, %cst_12 {dimension_numbers = #tpu.dot_dimension_numbers<[1], [0], [0], [1], [0, 0, 1, 1], [], []>} : vector<8x4xbf16>, vector<4x256xbf16>, vector<8x256xf32> -> vector<8x256xf32>
    %22 = arith.addf %16, %21 : vector<8x256xf32>
    %23 = tpu.iota {dimensions = array<i32: 1>} : vector<1x128xi32>
    %24 = tpu.concatenate %23, %23 in 1 : vector<1x128xi32>, vector<1x128xi32> -> vector<1x256xi32>
    %c15_i32 = arith.constant 15 : i32
    %25 = vector.broadcast %c15_i32 : i32 to vector<1x256xi32>
    %26 = arith.cmpi slt, %24, %25 : vector<1x256xi32>
    %cst_13 = arith.constant 0.000000e+00 : f32
    %27 = vector.shape_cast %26 : vector<1x256xi1> to vector<1x256xi1>
    %28 = vector.broadcast %27 : vector<1x256xi1> to vector<8x256xi1>
    %29 = vector.broadcast %cst_13 : f32 to vector<8x256xf32>
    %30 = arith.select %28, %22, %29 : vector<8x256xi1>, vector<8x256xf32>
    %cst_14 = arith.constant dense<0.000000e+00> : vector<8xf32>
    %31 = vector.multi_reduction <add>, %30, %cst_14 [1] : vector<8x256xf32> to vector<8xf32>
    %32 = vector.shape_cast %31 : vector<8xf32> to vector<8x1xf32>
    %33 = arith.mulf %30, %30 : vector<8x256xf32>
    %cst_15 = arith.constant dense<0.000000e+00> : vector<8xf32>
    %34 = vector.multi_reduction <add>, %33, %cst_15 [1] : vector<8x256xf32> to vector<8xf32>
    %35 = vector.shape_cast %34 : vector<8xf32> to vector<8x1xf32>
    %cst_16 = arith.constant 0.0333333351 : f32
    %36 = vector.broadcast %cst_16 : f32 to vector<8x1xf32>
    %37 = arith.mulf %32, %36 : vector<8x1xf32>
    %cst_17 = arith.constant 0.0333333351 : f32
    %38 = vector.broadcast %cst_17 : f32 to vector<8x1xf32>
    %39 = arith.mulf %35, %38 : vector<8x1xf32>
    %40 = arith.mulf %37, %37 : vector<8x1xf32>
    %41 = arith.subf %39, %40 : vector<8x1xf32>
    %cst_18 = arith.constant 9.99999974E-6 : f32
    %42 = vector.broadcast %cst_18 : f32 to vector<8x1xf32>
    %43 = arith.addf %41, %42 : vector<8x1xf32>
    %44 = math.rsqrt %43 : vector<8x1xf32>
    %c0_19 = arith.constant 0 : index
    %c0_20 = arith.constant 0 : index
    %45 = vector.load %arg2[%c0_19, %c0_20] : memref<8x1xf32, #tpu.memory_space<vmem>>, vector<8x1xf32>
    %46 = arith.mulf %44, %45 : vector<8x1xf32>
    %c0_21 = arith.constant 0 : index
    %c0_22 = arith.constant 0 : index
    %47 = vector.load %arg3[%c0_21, %c0_22] : memref<8x1xf32, #tpu.memory_space<vmem>>, vector<8x1xf32>
    %48 = arith.mulf %37, %46 : vector<8x1xf32>
    %49 = arith.subf %47, %48 : vector<8x1xf32>
    %50 = vector.broadcast %46 : vector<8x1xf32> to vector<8x256xf32>
    %51 = arith.mulf %30, %50 : vector<8x256xf32>
    %52 = vector.broadcast %49 : vector<8x1xf32> to vector<8x256xf32>
    %53 = arith.addf %51, %52 : vector<8x256xf32>
    %c0_23 = arith.constant 0 : index
    %c0_24 = arith.constant 0 : index
    %54 = vector.load %arg4[%c0_23, %c0_24] : memref<8x256xf32, #tpu.memory_space<vmem>>, vector<8x256xf32>
    %cst_25 = arith.constant 0.899999976 : f32
    %55 = vector.broadcast %cst_25 : f32 to vector<8x256xf32>
    %56 = arith.mulf %55, %54 : vector<8x256xf32>
    %57 = arith.addf %56, %53 : vector<8x256xf32>
    %cst_26 = arith.constant 1.000000e+00 : f32
    %58 = vector.broadcast %cst_26 : f32 to vector<8x256xf32>
    %59 = arith.cmpf ogt, %54, %58 : vector<8x256xf32>
    %cst_27 = arith.constant 1.000000e+00 : f32
    %cst_28 = arith.constant 0.000000e+00 : f32
    %60 = vector.broadcast %cst_27 : f32 to vector<8x256xf32>
    %61 = vector.broadcast %cst_28 : f32 to vector<8x256xf32>
    %62 = arith.select %59, %60, %61 : vector<8x256xi1>, vector<8x256xf32>
    %63 = arith.subf %57, %62 : vector<8x256xf32>
    %cst_29 = arith.constant 0.000000e+00 : f32
    %64 = vector.shape_cast %26 : vector<1x256xi1> to vector<1x256xi1>
    %65 = vector.broadcast %64 : vector<1x256xi1> to vector<8x256xi1>
    %66 = vector.broadcast %cst_29 : f32 to vector<8x256xf32>
    %67 = arith.select %65, %63, %66 : vector<8x256xi1>, vector<8x256xf32>
    %c0_30 = arith.constant 0 : index
    %c0_31 = arith.constant 0 : index
    %68 = vector.load %arg6[%c0_30, %c0_31] : memref<8x256xf32, #tpu.memory_space<vmem>>, vector<8x256xf32>
    tpu.vector_store %arg6[%c0_30, %c0_31], %67 {strides = array<i32>} : memref<8x256xf32, #tpu.memory_space<vmem>>, vector<8x256xf32>,
    %c255_i32_32 = arith.constant 255 : i32
    %69 = tpu.dynamic_rotate %67 by %c255_i32_32 dim 1 : vector<8x256xf32>, i32 -> vector<8x256xf32>
    %c254_i32_33 = arith.constant 254 : i32
    %70 = tpu.dynamic_rotate %67 by %c254_i32_33 dim 1 : vector<8x256xf32>, i32 -> vector<8x256xf32>
    %c253_i32 = arith.constant 253 : i32
    %71 = tpu.dynamic_rotate %67 by %c253_i32 dim 1 : vector<8x256xf32>, i32 -> vector<8x256xf32>
    %72 = arith.maximumf %67, %69 : vector<8x256xf32>
    %73 = arith.maximumf %70, %71 : vector<8x256xf32>
    %74 = arith.maximumf %72, %73 : vector<8x256xf32>
    %cst_34 = arith.constant 1.000000e+00 : f32
    %75 = vector.broadcast %cst_34 : f32 to vector<8x256xf32>
    %76 = arith.cmpf ogt, %74, %75 : vector<8x256xf32>
    %cst_35 = arith.constant 1.000000e+00 : f32
    %cst_36 = arith.constant 0.000000e+00 : f32
    %77 = vector.broadcast %cst_35 : f32 to vector<8x256xf32>
    %78 = vector.broadcast %cst_36 : f32 to vector<8x256xf32>
    %79 = arith.select %76, %77, %78 : vector<8x256xi1>, vector<8x256xf32>
    %c0_37 = arith.constant 0 : index
    %c0_38 = arith.constant 0 : index
    %80 = vector.load %arg5[%c0_37, %c0_38] : memref<8x256xf32, #tpu.memory_space<vmem>>, vector<8x256xf32>
    tpu.vector_store %arg5[%c0_37, %c0_38], %79 {strides = array<i32>} : memref<8x256xf32, #tpu.memory_space<vmem>>, vector<8x256xf32>,
    return
  }
}

</mosaic_0001>

<bundles_post_ra>
// kernel: mx_snn_block.1
= control target key start
LH: loop header
LB: loop body
LE: loop exit
PB: predicated region body
PF: predicated region fallthrough
CT: control target
= control target key end

     0   :  { %v415_v1 = vmov 0   ;;  %vm47_vm0 = vcmask 1041408   ;;  %s416_s23 = smov 127   ;;  %vm43_vm1 = vcmask 31744   ;;  %s418_s26 = smov 1   ;;  %v31_v8 = vlaneseq  ;;  %s551_s0 = inlined_call_operand.vmem [shape: f32[4,256], index: 0, kind: input, shape index: {}]   ;;  %s552_s1 = inlined_call_operand.vmem [shape: bf16[4,8,4], index: 1, kind: input, shape index: {}]   ;;  %s553_s2 = inlined_call_operand.vmem [shape: f32[8,1], index: 2, kind: input, shape index: {}]   ;;  %s554_s3 = inlined_call_operand.vmem [shape: f32[8,1], index: 3, kind: input, shape index: {}]   ;;  %s555_s4 = inlined_call_operand.vmem [shape: f32[8,256], index: 4, kind: input, shape index: {}, may-alias: {4,6}]   ;;  %s556_s6 = inlined_call_operand.vmem [shape: f32[8,256], index: 6, kind: output, shape index: {1}, may-alias: {4,6}]   ;;  %s557_s5 = inlined_call_operand.vmem [shape: f32[8,256], index: 5, kind: output, shape index: {0}]  }
   0x1   :  { %v23_v0 = vld [vmem:[%s551_s0] sm:$0xff]  ;;  %86 = vmatprep.mubr.bf16.mxu1 %v415_v1  ;;  %197 = vmatprep.mubr.bf16.mxu0 %v415_v1  ;;  %s417_s0 = smov 126   ;;  %v373_v29 = vld [vmem:[%s552_s1 + $0x8] sm:$0xf]  ;;  %v376_v36 = vld [vmem:[%s552_s1 + $0xc] sm:$0xf] }
   0x2   :  { %v25_v2 = vcombine.high %v23_v0, %v23_v0  ;;  %v41_v3 = vpack.c.bf16 %v23_v0, %v23_v0  ;;  %410 = vset.pattern.permute.xlu0 %v415_v1  ;;  %411 = vset.pattern.permute.xlu1 %v415_v1  ;;  %v368_v7 = vld [vmem:[%s552_s1 + $0x4] sm:$0xf]  ;;  %v472_v9 = vand.u32 127, %v31_v8  ;;  %v36_v35 = vld [vmem:[%s552_s1] sm:$0xf]  ;;  %v274_v37 = vshrl.u32 %v31_v8, 7 }
   0x3   :  { %s420_s17 = smov 125  }
   0x4   :  { %v395_v4 = vpack.i.bf16 %v25_v2, %v23_v0  ;;  %v42_v5 = vpack.c.bf16 %v25_v2, %v25_v2  ;;  %v49_v6 = vsel %vm47_vm0, %v41_v3, 0  ;;  %vm212_vm2 = vcmp.lt.s32.totalorder %v472_v9, 126  ;;  %v294_v0 = vld [vmem:[%s553_s2] sm:$0xff] }
   0x5   :  { %vm149_vm3 = vcmp.lt.s32.totalorder %v472_v9, 127  ;;  %vm33_vm4 = vcmp.lt.s32.totalorder %v472_v9, 1  ;;  %vm271_vm5 = vcmp.lt.s32.totalorder %v472_v9, 15  ;;  %v275_v39 = vsub.s32 0, %v274_v37  ;;  %v296_v3 = vld [vmem:[%s554_s3] sm:$0xff] }
   0x6   :  { %396 = vrot.lane.b32.xlu0 %v395_v4, %s416_s23  ;;  %406 = vrot.lane.b32.xlu1 %v395_v4, %s417_s0  ;;  %v272_v41 = vsel %vm271_vm5, 1, %v415_v1  ;;  %vm345_vm9 = vcmp.lt.s32.totalorder %v472_v9, 125 }
   0x7   :  { %369 = vmatprep.subr.msk.bf16.mxu1 %vm47_vm0, %v42_v5  ;;  %v276_v44 = vrot.slane %v272_v41, %v275_v39 }
   0x8   :  { %55 = vmatpush1.bf16.msra.mxu1 %v49_v6  ;;  %v313_v6 = vld [vmem:[%s555_s4] sm:$0xff] }
   0x9   :  { %vm277_vm6 = vcmp.eq.s32.totalorder %v276_v44, 1  ;;  %vm319_vm7 = vcmp.gt.f32.partialorder %v313_v6, 1.0 }
   0xa   :  { %401 = vrot.lane.b32.xlu0 %v395_v4, %s418_s26 }
   0xb   :  { %370 = vmatmul.mubr.msk.bf16.vlgmr.msra.gmra.mrb[0].mxu1 %vm43_vm1, %v368_v7  ;;  %v314_v7 = vld [vmem:[%s555_s4 + $0x8] sm:$0xff] }
   0xc   :  { %136 = vmatprep.mubr.bf16.mxu1 %v415_v1  ;;  %vm320_vm8 = vcmp.gt.f32.partialorder %v314_v7, 1.0 }
  0x78   :  { %v397_v10 = vpop.permute.xlu0 %396  ;;  %v407_v11 = vpop.permute.xlu1 %406 }
  0x79   :  { %v399_v12 = vunpack.i.h.bf16 %v397_v10  ;;  %v398_v13 = vunpack.i.l.bf16 %v397_v10  ;;  %v409_v14 = vunpack.i.h.bf16 %v407_v11  ;;  %v408_v15 = vunpack.i.l.bf16 %v407_v11 }
  0x7a   :  { %v315_v10 = vmul.f32 0.9, %v313_v6  ;;  %v316_v11 = vmul.f32 0.9, %v314_v7 }
  0x7b   :  { %v214_v16 = vsel %vm212_vm2, %v409_v14, %v408_v15  ;;  %v151_v17 = vsel %vm149_vm3, %v399_v12, %v398_v13  ;;  %v150_v18 = vsel %vm149_vm3, %v398_v13, %v399_v12  ;;  %v213_v19 = vsel %vm212_vm2, %v408_v15, %v409_v14 }
  0x7c   :  { %v218_v20 = vpack.c.bf16 %v214_v16, %v214_v16  ;;  %v402_v21 = vpop.permute.xlu0 %401  ;;  %v155_v22 = vpack.c.bf16 %v151_v17, %v151_v17  ;;  %v154_v23 = vpack.c.bf16 %v150_v18, %v150_v18  ;;  %v217_v24 = vpack.c.bf16 %v213_v19, %v213_v19 }
  0x7d   :  { %v404_v25 = vunpack.i.h.bf16 %v402_v21  ;;  %v403_v26 = vunpack.i.l.bf16 %v402_v21  ;;  %v419_v17 = vmov 0.0  }
  0x7e   :  { %374 = vmatprep.subr.msk.bf16.mxu0 %vm47_vm0, %v155_v22  ;;  %v160_v27 = vsel %vm47_vm0, %v154_v23, 0  ;;  %v223_v33 = vsel %vm47_vm0, %v217_v24, 0  ;;  %v321_v18 = vsel %vm319_vm7, 1.0, %v419_v17  ;;  %v322_v19 = vsel %vm320_vm8, 1.0, %v419_v17 }
  0x7f   :  { %v34_v28 = vsel %vm33_vm4, %v403_v26, %v404_v25  ;;  %166 = vmatpush1.bf16.msra.mxu0 %v160_v27  ;;  %v35_v30 = vsel %vm33_vm4, %v404_v25, %v403_v26 }
  0x80   :  { %v38_v31 = vpack.c.bf16 %v34_v28, %v34_v28  ;;  %377 = vmatprep.subr.msk.bf16.mxu0 %vm47_vm0, %v218_v20  ;;  %v37_v32 = vpack.c.bf16 %v35_v30, %v35_v30 }
  0x82   :  { %371 = vmatprep.subr.msk.bf16.mxu1 %vm47_vm0, %v38_v31  ;;  %375 = vmatmul.mubr.msk.bf16.vlgmr.msra.gmra.mrb[0].mxu0 %vm43_vm1, %v373_v29  ;;  %v99_v34 = vsel %vm47_vm0, %v37_v32, 0 }
  0x83   :  { %105 = vmatpush1.bf16.msra.mxu1 %v99_v34  ;;  %229 = vmatpush1.bf16.msra.mxu0 %v223_v33 }
  0x84   :  { %260 = vmatprep.mubr.bf16.mxu0 %v415_v1 }
  0x86   :  { %372 = vmatmul.mubr.msk.bf16.vlgmr.msra.gmra.mrb[0].mxu1 %vm43_vm1, %v36_v35 }
  0x8e   :  { %378 = vmatmul.mubr.msk.bf16.vlgmr.msra.gmra.mrb[0].mxu0 %vm43_vm1, %v376_v36 }
 0x159   :  { %v138_v38 = vpop.f32.mrb[0].mxu1 }
 0x15a   :  { %v140_v40 = vpop.f32.mrb[1].mxu1 }
 0x15b   :  { %v142_v42 = vpop.f32.mrb[2].mxu1 }
 0x15c   :  { %v143_v43 = vpop.f32.mrb[3].mxu1 }
 0x161   :  { %v262_v45 = vpop.f32.mrb[0].mxu0 }
 0x162   :  { %v379_v46 = vadd.f32 %v262_v45, %v138_v38  ;;  %v264_v47 = vpop.f32.mrb[1].mxu0 }
 0x163   :  { %v380_v48 = vadd.f32 %v264_v47, %v140_v40  ;;  %v266_v49 = vpop.f32.mrb[2].mxu0 }
 0x164   :  { %v278_v50 = vsel %vm277_vm6, %v379_v46, 0.0  ;;  %v267_v51 = vpop.f32.mrb[3].mxu0 }
 0x165   :  { %v279_v52 = vsel %vm277_vm6, %v380_v48, 0.0  ;;  %v283_v53 = vmul.f32 %v278_v50, %v278_v50 }
 0x166   :  { %v280_v54 = vadd.f32 %v279_v52, %v278_v50  ;;  %v284_v55 = vmul.f32 %v279_v52, %v279_v52 }
 0x168   :  { %281 = vadd.xlane.f32.xlu1 %v280_v54  ;;  %v285_v56 = vadd.f32 %v284_v55, %v283_v53 }
 0x16a   :  { %286 = vadd.xlane.f32.xlu0 %v285_v56 }
 0x1f5   :  { %v282_v57 = vpop.xlane.xlu1 %281 }
 0x1f6   :  { %v288_v58 = vmul.f32 0.033333335, %v282_v57 }
 0x1f7   :  { %v287_v59 = vpop.xlane.xlu0 %286 }
 0x1f8   :  { %v290_v60 = vmul.f32 %v288_v58, %v288_v58  ;;  %v289_v61 = vmul.f32 0.033333335, %v287_v59 }
 0x1fa   :  { %v291_v62 = vsub.f32 %v289_v61, %v290_v60 }
 0x1fc   :  { %v292_v63 = vadd.f32 1e-05, %v291_v62 }
 0x1fe   :  { %413 = vrsqrt.f32 %v292_v63 }
 0x208   :  { %v414_v1 = vpop.eup %413 }
 0x209   :  { %v295_v2 = vmul.f32 %v414_v1, %v294_v0 }
 0x20b   :  { %301 = vperm.xlu0 %410, %v295_v2   ;;  %v297_v4 = vmul.f32 %v295_v2, %v288_v58 }
 0x20d   :  { %v298_v5 = vsub.f32 %v296_v3, %v297_v4 }
 0x20f   :  { %308 = vperm.xlu1 %411, %v298_v5  }
 0x28a   :  { %v302_v8 = vpop.permute.xlu0 %301 }
 0x28b   :  { %v304_v12 = vmul.f32 %v302_v8, %v278_v50  ;;  %v305_v13 = vmul.f32 %v302_v8, %v279_v52 }
 0x28e   :  { %v309_v14 = vpop.permute.xlu1 %308 }
 0x28f   :  { %v311_v15 = vadd.f32 %v309_v14, %v304_v12  ;;  %v312_v16 = vadd.f32 %v309_v14, %v305_v13 }
 0x291   :  { %v317_v20 = vadd.f32 %v315_v10, %v311_v15  ;;  %v318_v21 = vadd.f32 %v316_v11, %v312_v16 }
 0x293   :  { %v323_v22 = vsub.f32 %v317_v20, %v321_v18  ;;  %v324_v23 = vsub.f32 %v318_v21, %v322_v19 }
 0x295   :  { %v325_v24 = vsel %vm277_vm6, %v323_v22, 0.0  ;;  %v326_v25 = vsel %vm277_vm6, %v324_v23, 0.0 }
 0x296   :  { %329 = vrot.lane.b32.xlu1 %v325_v24, %s416_s23  ;;  %327 = vst [vmem:[%s556_s6] sm:$0xff] %v325_v24  ;;  %328 = vst [vmem:[%s556_s6 + $0x8] sm:$0xff] %v326_v25 }
 0x29a   :  { %331 = vrot.lane.b32.xlu1 %v326_v25, %s416_s23 }
 0x29e   :  { %335 = vrot.lane.b32.xlu1 %v325_v24, %s417_s0 }
 0x2a2   :  { %337 = vrot.lane.b32.xlu1 %v326_v25, %s417_s0 }
 0x2a6   :  { %341 = vrot.lane.b32.xlu1 %v325_v24, %s420_s17 }
 0x2aa   :  { %343 = vrot.lane.b32.xlu1 %v326_v25, %s420_s17 }
 0x308   :  { %v330_v26 = vpop.permute.xlu1 %329 }
 0x30c   :  { %v332_v27 = vpop.permute.xlu1 %331 }
 0x30d   :  { %v333_v31 = vsel %vm149_vm3, %v330_v26, %v332_v27  ;;  %v334_v32 = vsel %vm149_vm3, %v332_v27, %v330_v26 }
 0x30e   :  { %v348_v38 = vmax.f32 %v325_v24, %v333_v31  ;;  %v349_v39 = vmax.f32 %v326_v25, %v334_v32 }
 0x310   :  { %v336_v28 = vpop.permute.xlu1 %335 }
 0x314   :  { %v338_v29 = vpop.permute.xlu1 %337 }
 0x315   :  { %v339_v34 = vsel %vm212_vm2, %v336_v28, %v338_v29  ;;  %v340_v35 = vsel %vm212_vm2, %v338_v29, %v336_v28 }
 0x318   :  { %v342_v30 = vpop.permute.xlu1 %341 }
 0x31c   :  { %v344_v33 = vpop.permute.xlu1 %343 }
 0x31d   :  { %v346_v36 = vsel %vm345_vm9, %v342_v30, %v344_v33  ;;  %v347_v37 = vsel %vm345_vm9, %v344_v33, %v342_v30 }
 0x31e   :  { %v350_v40 = vmax.f32 %v339_v34, %v346_v36  ;;  %v351_v41 = vmax.f32 %v340_v35, %v347_v37 }
 0x320   :  { %v352_v42 = vmax.f32 %v348_v38, %v350_v40  ;;  %v353_v43 = vmax.f32 %v349_v39, %v351_v41 }
 0x322   :  { %vm354_vm10 = vcmp.gt.f32.partialorder %v352_v42, 1.0  ;;  %vm355_vm11 = vcmp.gt.f32.partialorder %v353_v43, 1.0 }
 0x323   :  { %v356_v44 = vsel %vm354_vm10, 1.0, %v419_v17  ;;  %v357_v45 = vsel %vm355_vm11, 1.0, %v419_v17 }
 0x324   :  { %358 = vst [vmem:[%s557_s5] sm:$0xff] %v356_v44  ;;  %359 = vst [vmem:[%s557_s5 + $0x8] sm:$0xff] %v357_v45 }

</bundles_post_ra>
